<compile_context>
chip_gen: v7x
topology: tpu7x:2x2x1
jax: 0.10.0
libtpu: 0.0.40
codegen_flags: <defaults>
</compile_context>

<pallas_src>
import functools
import math

import jax
import jax.numpy as jnp
from jax.experimental import pallas as pl
from jax.experimental.pallas import tpu as pltpu


# --------------------------------------------------------------------------- #
# Small helpers
# --------------------------------------------------------------------------- #
def _round_up(x: int, m: int) -> int:
    return ((x + m - 1) // m) * m


def _cdiv(a: int, b: int) -> int:
    return (a + b - 1) // b


_ONES_BUDGET = 2 << 20   # cap on the block-diagonal ones matrix (f32 bytes)
_RESERVE = 4 << 20       # acc/out blocks + compiler-internal scratch headroom


def _vmem_budget():
    """(tile_budget_bytes, vmem_limit_bytes), padding-aware, per generation."""
    phys = 64 << 20                                   # safe for v5e/v6e/v7x
    try:
        info = pltpu.get_tpu_info()
        phys = int(getattr(info, "vmem_capacity_bytes", phys)) or phys
    except Exception:
        pass
    budget = min((phys * 3) // 4, 96 << 20)           # 48 MiB on v7x, 96 MiB on v5e/v6e
    limit = min(phys, budget + (8 << 20))
    return budget, limit


def _pick_tb(B: int, align: int, tb_max: int, work_bytes: int) -> int:
    """Batch tile: <= B and (== B or a multiple of `align`)."""
    tb_max = max(1, min(int(tb_max), 2048))
    if tb_max >= B or B <= align:
        tb = B
    else:
        tb = max(align, (tb_max // align) * align)
    # v7x megacore: prefer >=2 comparable batch steps when one block would hold
    # all work and the kernel is big enough to be worth splitting across cores.
    if tb == B and B >= 2 * align and work_bytes >= (8 << 20):
        tb = min(B, _round_up(_cdiv(B, 2), align))
    return tb


def _validate_tb(tb: int, B: int, align: int):
    assert 1 <= tb <= B and (tb == B or tb % align == 0), (
        f"batch_tile must be <= {B} and either == {B} or a multiple of {align}; got {tb}")


# --------------------------------------------------------------------------- #
# Kernels
# --------------------------------------------------------------------------- #
def _center_kernel(r_ref, c_ref, out_ref):
    """r_ref/c_ref: [tb, 1, D] (center row only); out_ref: [tb, 1] f32."""
    r = r_ref[...].astype(jnp.float32)
    c = c_ref[...].astype(jnp.float32)
    dots = jnp.sum(r * c, axis=-1)                               # [tb, 1]
    out_ref[...] = jnp.sqrt(jnp.maximum(2.0 - 2.0 * dots, 0.0))


def _center_flat_kernel(r_ref, c_ref, out_ref, *, off, D):
    """r_ref/c_ref: [tb, Wb] slabs of the flattened [B, S*D] arrays containing
    the center row at lane offset `off`; out_ref: [tb, 1] f32."""
    r = r_ref[:, off:off + D].astype(jnp.float32)
    c = c_ref[:, off:off + D].astype(jnp.float32)
    dots = jnp.sum(r * c, axis=-1, keepdims=True)                # [tb, 1]
    out_ref[...] = jnp.sqrt(jnp.maximum(2.0 - 2.0 * dots, 0.0))


def _mean_plain_kernel(r_ref, c_ref, out_ref, acc_ref, *, S, ts, ragged):
    """r_ref/c_ref: [tb, ts, D]; out_ref: [tb, 1] f32; acc_ref: [tb, 1] f32 scratch."""
    s = pl.program_id(1)

    @pl.when(s == 0)
    def _init():
        acc_ref[...] = jnp.zeros_like(acc_ref)

    r = r_ref[...].astype(jnp.float32)
    c = c_ref[...].astype(jnp.float32)
    dots = jnp.sum(r * c, axis=-1)                               # [tb, ts]
    dis = jnp.sqrt(jnp.maximum(2.0 - 2.0 * dots, 0.0))
    if ragged:  # mask garbage rows of the edge-padded last S tile
        row = s * ts + jax.lax.broadcasted_iota(jnp.int32, dis.shape, 1)
        dis = jnp.where(row < S, dis, 0.0)
    acc_ref[...] += jnp.sum(dis, axis=-1, keepdims=True)

    @pl.when(s == pl.num_programs(1) - 1)
    def _finalize():
        out_ref[...] = acc_ref[...] * (1.0 / S)


def _mean_packed_kernel(ones_ref, r_ref, c_ref, out_ref, acc_ref, *, S, R, D, ragged):
    """Lane-dense path (D | 128). r_ref/c_ref: [tb, R*D] slabs of [B, S*D];
    ones_ref: [R*D, R] block-diagonal ones; out/acc: [tb, 1] f32."""
    s = pl.program_id(1)

    @pl.when(s == 0)
    def _init():
        acc_ref[...] = jnp.zeros_like(acc_ref)

    prod = r_ref[...].astype(jnp.float32) * c_ref[...].astype(jnp.float32)  # [tb, R*D]
    if ragged:  # zero garbage lanes of the edge-padded last S tile (NaN*0 safety)
        lane = s * (R * D) + jax.lax.broadcasted_iota(jnp.int32, prod.shape, 1)
        prod = jnp.where(lane < S * D, prod, 0.0)
    # Per-row D-segment sums via a block-diagonal ones matmul (idle MXU): keeps
    # loads/stores lane-dense instead of summing a D<128-wide last axis.
    dots = jnp.dot(prod, ones_ref[...], preferred_element_type=jnp.float32,
                   precision=jax.lax.Precision.HIGHEST)                     # [tb, R]
    dis = jnp.sqrt(jnp.maximum(2.0 - 2.0 * dots, 0.0))
    if ragged:  # drop rows that don't exist
        row = s * R + jax.lax.broadcasted_iota(jnp.int32, dis.shape, 1)
        dis = jnp.where(row < S, dis, 0.0)
    acc_ref[...] += jnp.sum(dis, axis=-1, keepdims=True)

    @pl.when(s == pl.num_programs(1) - 1)
    def _finalize():
        out_ref[...] = acc_ref[...] * (1.0 / S)


# --------------------------------------------------------------------------- #
# Wrapper
# --------------------------------------------------------------------------- #
def mavnet_forward(r: jax.Array, c: jax.Array, method: str = "mean",
                   *, batch_tile: int | None = None,
                   seq_tile: int | None = None) -> jax.Array:
    """Pallas equivalent of mavNet.forward((r, c, method)). Returns shape [B]."""
    assert r.shape == c.shape and r.ndim == 3 and r.dtype == c.dtype
    B, S, D = r.shape
    itemsize = jnp.dtype(r.dtype).itemsize
    q = max(8, 32 // itemsize)          # sublane quantum for the input dtype
    Dp = _round_up(D, 128)              # lane-padded descriptor width
    budget, vmem_limit = _vmem_budget()
    per_buf = max(1, (budget - _RESERVE) // 4)   # 2 inputs x 2 pipeline buffers

    # ------------------------------- centerOnly ------------------------------ #
    if method == "centerOnly":
        cost = pl.CostEstimate(flops=2 * B * D, transcendentals=B,
                               bytes_accessed=2 * B * D * itemsize + B * 4)
        cparams = pltpu.CompilerParams(dimension_semantics=("parallel",),
                                       vmem_limit_bytes=vmem_limit)
        start = (S // 2) * D
        flat_ok = (D % 128 == 0) or (128 % D == 0 and S * D >= 128)
        if flat_ok:
            # Pull the center row from the flattened [B, S*D] view with a
            # lane-aligned block (no XLA slice round trip, no masked DMA).
            Wb = D if D % 128 == 0 else 128
            blk_i = start // Wb
            off = start % Wb
            tb_max = per_buf // (_round_up(Wb, 128) * itemsize)
            tb = batch_tile if batch_tile is not None else _pick_tb(B, q, tb_max, 0)
            _validate_tb(tb, B, q)
            kernel = functools.partial(_center_flat_kernel, off=off, D=D)
            out = pl.pallas_call(
                kernel,
                out_shape=jax.ShapeDtypeStruct((B, 1), jnp.float32),
                grid=(_cdiv(B, tb),),
                in_specs=[pl.BlockSpec((tb, Wb), lambda b: (b, blk_i)),
                          pl.BlockSpec((tb, Wb), lambda b: (b, blk_i))],
                out_specs=pl.BlockSpec((tb, 1), lambda b: (b, 0)),
                compiler_params=cparams,
                cost_estimate=cost,
            )(r.reshape(B, S * D), c.reshape(B, S * D))
        else:
            # Generic D: single-row block straight out of the [B, S, D] tensor.
            tb_max = per_buf // (q * Dp * itemsize)
            tb = batch_tile if batch_tile is not None else _pick_tb(B, 8, tb_max, 0)
            _validate_tb(tb, B, 8)
            out = pl.pallas_call(
                _center_kernel,
                out_shape=jax.ShapeDtypeStruct((B, 1), jnp.float32),
                grid=(_cdiv(B, tb),),
                in_specs=[pl.BlockSpec((tb, 1, D), lambda b: (b, S // 2, 0)),
                          pl.BlockSpec((tb, 1, D), lambda b: (b, S // 2, 0))],
                out_specs=pl.BlockSpec((tb, 1), lambda b: (b, 0)),
                compiler_params=cparams,
                cost_estimate=cost,
            )(r, c)
        return out[:, 0].astype(r.dtype)

    # --------------------------------- mean ---------------------------------- #
    cost = pl.CostEstimate(flops=2 * B * S * D + 2 * B * S, transcendentals=B * S,
                           bytes_accessed=2 * B * S * D * itemsize + B * 4)
    cparams = pltpu.CompilerParams(dimension_semantics=("parallel", "arbitrary"),
                                   vmem_limit_bytes=vmem_limit)
    work_bytes = B * S * D * itemsize

    use_packed = (D < 128) and (128 % D == 0) and ((S * D) % 128 == 0)
    if use_packed:
        # Lane-dense path: [B, S*D] tiles, segment sums done on the MXU.
        G = 128 // D                                     # rows per 128-lane group
        r_cap = max(G, math.isqrt(max(1, _ONES_BUDGET // (4 * D))))
        R = seq_tile if seq_tile is not None else max(G, (min(S, r_cap) // G) * G)
        assert 1 <= R <= S and R % G == 0, \
            f"seq_tile must be <= {S} and a multiple of {G}"
        ones_bytes = (R * D) * _round_up(R, 128) * 4     # lane-padded f32 footprint
        per_buf_p = max(1, (budget - _RESERVE - 2 * ones_bytes) // 4)
        tb_max = per_buf_p // (R * D * itemsize)
        tb = batch_tile if batch_tile is not None else _pick_tb(B, q, tb_max, work_bytes)
        _validate_tb(tb, B, q)

        seg = jnp.arange(R * D, dtype=jnp.int32) // D
        ones = (seg[:, None] == jnp.arange(R, dtype=jnp.int32)[None, :]).astype(jnp.float32)

        kernel = functools.partial(_mean_packed_kernel, S=S, R=R, D=D,
                                   ragged=(S % R != 0))
        out = pl.pallas_call(
            kernel,
            out_shape=jax.ShapeDtypeStruct((B, 1), jnp.float32),
            grid=(_cdiv(B, tb), _cdiv(S, R)),
            in_specs=[pl.BlockSpec((R * D, R), lambda b, s: (0, 0)),   # stays resident
                      pl.BlockSpec((tb, R * D), lambda b, s: (b, s)),
                      pl.BlockSpec((tb, R * D), lambda b, s: (b, s))],
            out_specs=pl.BlockSpec((tb, 1), lambda b, s: (b, 0)),
            scratch_shapes=[pltpu.VMEM((tb, 1), jnp.float32)],
            compiler_params=cparams,
            cost_estimate=cost,
        )(ones, r.reshape(B, S * D), c.reshape(B, S * D))
    else:
        # General path on [B, S, D]; VMEM accounting includes lane/sublane padding.
        row_pad = _round_up(S, q) * Dp * itemsize        # one full [S, D] row in VMEM
        if row_pad <= per_buf:
            ts = S
            tb = batch_tile if batch_tile is not None else \
                _pick_tb(B, 8, per_buf // row_pad, work_bytes)
        else:
            tb = batch_tile if batch_tile is not None else (8 if B >= 8 else B)
            ts_max = per_buf // max(1, tb * Dp * itemsize)
            ts = max(q, (min(ts_max, S) // q) * q)
        if seq_tile is not None:
            ts = seq_tile
        _validate_tb(tb, B, 8)
        assert 1 <= ts <= S and (ts == S or ts % q == 0), \
            f"seq_tile must be {S} or a multiple of {q} (<= {S})"

        kernel = functools.partial(_mean_plain_kernel, S=S, ts=ts,
                                   ragged=(S % ts != 0))
        out = pl.pallas_call(
            kernel,
            out_shape=jax.ShapeDtypeStruct((B, 1), jnp.float32),
            grid=(_cdiv(B, tb), _cdiv(S, ts)),
            in_specs=[pl.BlockSpec((tb, ts, D), lambda b, s: (b, s, 0)),
                      pl.BlockSpec((tb, ts, D), lambda b, s: (b, s, 0))],
            out_specs=pl.BlockSpec((tb, 1), lambda b, s: (b, 0)),
            scratch_shapes=[pltpu.VMEM((tb, 1), jnp.float32)],
            compiler_params=cparams,
            cost_estimate=cost,
        )(r, c)
    return out[:, 0].astype(r.dtype)


# --------------------------------------------------------------------------- #
# Pure-JAX reference (mirrors the PyTorch module: full cdist then diagonal)
# --------------------------------------------------------------------------- #
def _reference(r, c, method):
    r32 = r.astype(jnp.float32)
    c32 = c.astype(jnp.float32)
    dmat = jnp.sqrt(2.0 - 2.0 * jnp.einsum("bsd,btd->bst", r32, c32,
                                           precision="highest"))
    dis = jnp.diagonal(dmat, 0, 1, 2)                    # [B, S]
    if method == "centerOnly":
        return dis[:, dis.shape[1] // 2]
    return dis.mean(-1)


# --------------------------------------------------------------------------- #
# Self-test
# --------------------------------------------------------------------------- #
if __name__ == "__main__":
    def make_inputs(key, B, S, D):
        kr, kc = jax.random.split(key)
        r = jax.random.normal(kr, (B, S, D), dtype=jnp.float32)
        c = jax.random.normal(kc, (B, S, D), dtype=jnp.float32)
        # Unit-normalize descriptors so 2 - 2*cos >= 0 (as the cdist formula assumes).
        r = r / jnp.linalg.norm(r, axis=-1, keepdims=True)
        c = c / jnp.linalg.norm(c, axis=-1, keepdims=True)
        return r, c

    def check(name, got, want, atol=1e-4):
        assert got.shape == want.shape, (name, got.shape, want.shape)
        assert jnp.allclose(got, want, atol=atol, rtol=1e-4), (name, got, want)

    key = jax.random.PRNGKey(0)
    k1, k2, k3 = jax.random.split(key, 3)

    # 1) Spec shapes (B=2, S=8, D=32): lane-packed mean path + flattened centerOnly.
    r, c = make_inputs(k1, 2, 8, 32)
    out_mean = jax.block_until_ready(mavnet_forward(r, c, "mean"))
    out_center = jax.block_until_ready(mavnet_forward(r, c, "centerOnly"))
    assert out_mean.shape == (2,) and out_center.shape == (2,)
    check("mean (spec)", out_mean, _reference(r, c, "mean"))
    check("centerOnly (spec)", out_center, _reference(r, c, "centerOnly"))

    # 2) Multi-step 2-D grid with ragged S tiles (packed path, accumulator + masks).
    r2, c2 = make_inputs(k2, 16, 40, 32)
    out2 = jax.block_until_ready(
        mavnet_forward(r2, c2, "mean", batch_tile=8, seq_tile=16))
    check("mean packed tiled", out2, _reference(r2, c2, "mean"))
    out2c = jax.block_until_ready(
        mavnet_forward(r2, c2, "centerOnly", batch_tile=8))
    check("centerOnly tiled", out2c, _reference(r2, c2, "centerOnly"))

    # 3) Plain path (D multiple of 128) with ragged S tiling over the grid.
    r3, c3 = make_inputs(k3, 4, 20, 128)
    out3 = jax.block_until_ready(mavnet_forward(r3, c3, "mean", seq_tile=8))
    check("mean plain tiled", out3, _reference(r3, c3, "mean"))

    print("KERNEL_OK")
</pallas_src>

<mosaic_0001>
module attributes {stable_mosaic.version = 11 : i64} {
  func.func @_mean_packed_kernel(%arg0: i32, %arg1: i32, %arg2: memref<256x8xf32, #tpu.memory_space<vmem>>, %arg3: memref<2x256xf32, #tpu.memory_space<vmem>>, %arg4: memref<2x256xf32, #tpu.memory_space<vmem>>, %arg5: memref<2x1xf32, #tpu.memory_space<vmem>>, %arg6: memref<2x1xf32, #tpu.memory_space<vmem>>) attributes {dimension_semantics = [#tpu.dimension_semantics<parallel>, #tpu.dimension_semantics<arbitrary>], iteration_bounds = array<i64: 1, 1>, scalar_prefetch = 0 : i64, scratch_operands = 1 : i64, tpu.core_type = #tpu.core_type<tc>, window_params = [{pipeline_mode = #tpu.pipeline_mode<synchronous>, transform_indices = @transform_0, window_bounds = array<i64: 256, 8>}, {transform_indices = @transform_1, window_bounds = array<i64: 2, 256>}, {transform_indices = @transform_2, window_bounds = array<i64: 2, 256>}, {transform_indices = @transform_3, window_bounds = array<i64: 2, 1>}]} {
    %c0_i32 = arith.constant 0 : i32
    %0 = arith.cmpi eq, %arg1, %c0_i32 : i32
    %1 = arith.extui %0 : i1 to i32
    %c0_i32_0 = arith.constant 0 : i32
    %2 = arith.cmpi ne, %1, %c0_i32_0 : i32
    scf.if %2 {
      %cst_16 = arith.constant 0.000000e+00 : f32
      %23 = vector.broadcast %cst_16 : f32 to vector<2x1xf32>
      %c0_17 = arith.constant 0 : index
      %c0_18 = arith.constant 0 : index
      %24 = vector.load %arg6[%c0_17, %c0_18] : memref<2x1xf32, #tpu.memory_space<vmem>>, vector<2x1xf32>
      tpu.vector_store %arg6[%c0_17, %c0_18], %23 {strides = array<i32>} : memref<2x1xf32, #tpu.memory_space<vmem>>, vector<2x1xf32>,
    } else {
    }
    %c0 = arith.constant 0 : index
    %c0_1 = arith.constant 0 : index
    %3 = vector.load %arg3[%c0, %c0_1] : memref<2x256xf32, #tpu.memory_space<vmem>>, vector<2x256xf32>
    %c0_2 = arith.constant 0 : index
    %c0_3 = arith.constant 0 : index
    %4 = vector.load %arg4[%c0_2, %c0_3] : memref<2x256xf32, #tpu.memory_space<vmem>>, vector<2x256xf32>
    %5 = arith.mulf %3, %4 : vector<2x256xf32>
    %c0_4 = arith.constant 0 : index
    %c0_5 = arith.constant 0 : index
    %6 = vector.load %arg2[%c0_4, %c0_5] : memref<256x8xf32, #tpu.memory_space<vmem>>, vector<256x8xf32>
    %cst = arith.constant dense<0.000000e+00> : vector<2x8xf32>
    %7 = tpu.matmul %5, %6, %cst {dimension_numbers = #tpu.dot_dimension_numbers<[1], [0], [0], [1], [0, 0, 1, 1], [], []>, precision = #tpu.contract_precision<fp32>} : vector<2x256xf32>, vector<256x8xf32>, vector<2x8xf32> -> vector<2x8xf32>
    %cst_6 = arith.constant 2.000000e+00 : f32
    %8 = vector.broadcast %cst_6 : f32 to vector<2x8xf32>
    %9 = arith.mulf %8, %7 : vector<2x8xf32>
    %cst_7 = arith.constant 2.000000e+00 : f32
    %10 = vector.broadcast %cst_7 : f32 to vector<2x8xf32>
    %11 = arith.subf %10, %9 : vector<2x8xf32>
    %cst_8 = arith.constant 0.000000e+00 : f32
    %12 = vector.broadcast %cst_8 : f32 to vector<2x8xf32>
    %13 = arith.maximumf %11, %12 : vector<2x8xf32>
    %14 = math.sqrt %13 : vector<2x8xf32>
    %c0_9 = arith.constant 0 : index
    %c0_10 = arith.constant 0 : index
    %15 = vector.load %arg6[%c0_9, %c0_10] : memref<2x1xf32, #tpu.memory_space<vmem>>, vector<2x1xf32>
    %cst_11 = arith.constant dense<0.000000e+00> : vector<2xf32>
    %16 = vector.multi_reduction <add>, %14, %cst_11 [1] : vector<2x8xf32> to vector<2xf32>
    %17 = vector.shape_cast %16 : vector<2xf32> to vector<2x1xf32>
    %18 = arith.addf %15, %17 : vector<2x1xf32>
    %c0_12 = arith.constant 0 : index
    %c0_13 = arith.constant 0 : index
    %19 = vector.load %arg6[%c0_12, %c0_13] : memref<2x1xf32, #tpu.memory_space<vmem>>, vector<2x1xf32>
    tpu.vector_store %arg6[%c0_12, %c0_13], %18 {strides = array<i32>} : memref<2x1xf32, #tpu.memory_space<vmem>>, vector<2x1xf32>,
    %c0_i32_14 = arith.constant 0 : i32
    %20 = arith.cmpi eq, %arg1, %c0_i32_14 : i32
    %21 = arith.extui %20 : i1 to i32
    %c0_i32_15 = arith.constant 0 : i32
    %22 = arith.cmpi ne, %21, %c0_i32_15 : i32
    scf.if %22 {
      %c0_16 = arith.constant 0 : index
      %c0_17 = arith.constant 0 : index
      %23 = vector.load %arg6[%c0_16, %c0_17] : memref<2x1xf32, #tpu.memory_space<vmem>>, vector<2x1xf32>
      %cst_18 = arith.constant 1.250000e-01 : f32
      %24 = vector.broadcast %cst_18 : f32 to vector<2x1xf32>
      %25 = arith.mulf %23, %24 : vector<2x1xf32>
      %c0_19 = arith.constant 0 : index
      %c0_20 = arith.constant 0 : index
      %26 = vector.load %arg5[%c0_19, %c0_20] : memref<2x1xf32, #tpu.memory_space<vmem>>, vector<2x1xf32>
      tpu.vector_store %arg5[%c0_19, %c0_20], %25 {strides = array<i32>} : memref<2x1xf32, #tpu.memory_space<vmem>>, vector<2x1xf32>,
    } else {
    }
    return
  }
  func.func @transform_0(%arg0: i32, %arg1: i32) -> (i32, i32) {
    %c0_i32 = arith.constant 0 : i32
    %c0_i32_0 = arith.constant 0 : i32
    %c0_i32_1 = arith.constant 0 : i32
    return %c0_i32, %c0_i32_0 : i32, i32
  }
  func.func @transform_1(%arg0: i32, %arg1: i32) -> (i32, i32) {
    %c0_i32 = arith.constant 0 : i32
    return %arg0, %arg1 : i32, i32
  }
  func.func @transform_2(%arg0: i32, %arg1: i32) -> (i32, i32) {
    %c0_i32 = arith.constant 0 : i32
    return %arg0, %arg1 : i32, i32
  }
  func.func @transform_3(%arg0: i32, %arg1: i32) -> (i32, i32) {
    %c0_i32 = arith.constant 0 : i32
    %c0_i32_0 = arith.constant 0 : i32
    return %arg0, %c0_i32 : i32, i32
  }
}

</mosaic_0001>

<bundles_post_ra>
// kernel: tpu_custom_call.1
= control target key start
LH: loop header
LB: loop body
LE: loop exit
PB: predicated region body
PF: predicated region fallthrough
CT: control target
= control target key end

     0   :  { %v1362_v3 = vmov 1983009808   ;;  %vm18_vm0 = vcmask 1024   ;;  %vm939_vm2 = vcmask 58368   ;;  %s1915_s0 = inlined_call_operand.vmem [shape: f32[256,8], index: 0, kind: input, shape index: {}]   ;;  %s1916_s1 = inlined_call_operand.vmem [shape: f32[2,256], index: 1, kind: input, shape index: {}]   ;;  %s1917_s2 = inlined_call_operand.vmem [shape: f32[2,256], index: 2, kind: input, shape index: {}]   ;;  %s1918_s3 = inlined_call_operand.vmem [shape: f32[2,1], index: 3, kind: output, shape index: {}]  }
   0x1   :  { %v39_v0 = vld [vmem:[%s1915_s0 + $0x80] sm:$0xff]  ;;  %v40_v1 = vld [vmem:[%s1915_s0 + $0x88] sm:$0xff]  ;;  %v1393_v4 = vunpack.c.l.s4 %v1362_v3  ;;  %v41_v9 = vld [vmem:[%s1915_s0 + $0x90] sm:$0xff] }
   0x2   :  { %v23_v2 = vld [vmem:[%s1915_s0] sm:$0xff]  ;;  %v115_v5 = vand.u32 4294901760, %v39_v0  ;;  %v118_v6 = vand.u32 4294901760, %v40_v1  ;;  %v24_v7 = vld [vmem:[%s1915_s0 + $0x8] sm:$0xff]  ;;  %v42_v10 = vld [vmem:[%s1915_s0 + $0x98] sm:$0xff]  ;;  %v121_v12 = vand.u32 4294901760, %v41_v9 }
   0x3   :  { %v67_v8 = vand.u32 4294901760, %v23_v2  ;;  %v70_v11 = vand.u32 4294901760, %v24_v7  ;;  %v124_v13 = vand.u32 4294901760, %v42_v10  ;;  %v25_v14 = vld [vmem:[%s1915_s0 + $0x10] sm:$0xff]  ;;  %v26_v15 = vld [vmem:[%s1915_s0 + $0x18] sm:$0xff]  ;;  %v43_v21 = vld [vmem:[%s1915_s0 + $0xa0] sm:$0xff] }
   0x4   :  { %v1410_v17 = vpack.c.bf16 %v118_v6, %v115_v5  ;;  %v73_v19 = vand.u32 4294901760, %v25_v14  ;;  %v76_v20 = vand.u32 4294901760, %v26_v15  ;;  %v44_v22 = vld [vmem:[%s1915_s0 + $0xa8] sm:$0xff]  ;;  %v27_v26 = vld [vmem:[%s1915_s0 + $0x20] sm:$0xff]  ;;  %v1434_v29 = vsub.f32 %v41_v9, %v121_v12  ;;  %v45_v41 = vld [vmem:[%s1915_s0 + $0xb0] sm:$0xff] }
   0x5   :  { %v1412_v18 = vsub.f32 %v23_v2, %v67_v8  ;;  %v1420_v23 = vpack.c.bf16 %v70_v11, %v67_v8  ;;  %v1422_v24 = vsub.f32 %v24_v7, %v70_v11  ;;  %v1424_v25 = vpack.c.bf16 %v124_v13, %v121_v12  ;;  %v28_v27 = vld [vmem:[%s1915_s0 + $0x28] sm:$0xff]  ;;  %v46_v46 = vld [vmem:[%s1915_s0 + $0xb8] sm:$0xff]  ;;  %v29_v59 = vld [vmem:[%s1915_s0 + $0x30] sm:$0xff] }
   0x6   :  { %1167 = vmatprep.subr.bf16.mxu0 %v1410_v17  ;;  %v1436_v30 = vsub.f32 %v42_v10, %v124_v13  ;;  %v1438_v31 = vpack.c.bf16 %v76_v20, %v73_v19  ;;  %v1440_v32 = vsub.f32 %v25_v14, %v73_v19  ;;  %v127_v33 = vand.u32 4294901760, %v43_v21  ;;  %v30_v60 = vld [vmem:[%s1915_s0 + $0x38] sm:$0xff]  ;;  %v47_v10 = vld [vmem:[%s1915_s0 + $0xc0] sm:$0xff]  ;;  %v48_v11 = vld [vmem:[%s1915_s0 + $0xc8] sm:$0xff] }
   0x7   :  { %1169 = vmatpush3.bf16.msra.mxu0 %v1420_v23  ;;  %v130_v34 = vand.u32 4294901760, %v44_v22  ;;  %v1443_v35 = vsub.f32 %v39_v0, %v115_v5  ;;  %v1445_v36 = vsub.f32 %v40_v1, %v118_v6  ;;  %v79_v37 = vand.u32 4294901760, %v27_v26  ;;  %v31_v19 = vld [vmem:[%s1915_s0 + $0x40] sm:$0xff] }
   0x8   :  { %1171 = vmatprep.subr.bf16.mxu0 %v1424_v25  ;;  %v82_v38 = vand.u32 4294901760, %v28_v27  ;;  %v1934_v39 = vand.u32 4294901760, %v1412_v18  ;;  %v1933_v40 = vand.u32 4294901760, %v1422_v24  ;;  %v1453_v42 = vsub.f32 %v26_v15, %v76_v20 }
   0x9   :  { %v1455_v43 = vpack.c.bf16 %v130_v34, %v127_v33  ;;  %v1457_v44 = vsub.f32 %v43_v21, %v127_v33  ;;  %v1937_v45 = vand.u32 4294901760, %v1443_v35  ;;  %v1463_v47 = vsub.f32 %v44_v22, %v130_v34 }
   0xa   :  { %v1935_v48 = vand.u32 4294901760, %v1445_v36  ;;  %v1466_v49 = vpack.c.bf16 %v82_v38, %v79_v37  ;;  %v1468_v50 = vsub.f32 %v27_v26, %v79_v37  ;;  %v182_v52 = vsub.f32 %v1412_v18, %v1934_v39 }
   0xb   :  { %1173 = vmatpush3.bf16.msra.mxu0 %v1438_v31  ;;  %v294_v51 = vsub.f32 %v1443_v35, %v1937_v45  ;;  %v189_v53 = vsub.f32 %v1422_v24, %v1933_v40  ;;  %v133_v54 = vand.u32 4294901760, %v45_v41  ;;  %v136_v56 = vand.u32 4294901760, %v46_v46 }
   0xc   :  { %1175 = vmatprep.subr.bf16.mxu0 %v1455_v43  ;;  %v301_v55 = vsub.f32 %v1445_v36, %v1935_v48  ;;  %v1930_v57 = vand.u32 4294901760, %v1434_v29  ;;  %v1928_v58 = vand.u32 4294901760, %v1436_v30  ;;  %v1492_v62 = vsub.f32 %v28_v27, %v82_v38  ;;  %v32_v38 = vld [vmem:[%s1915_s0 + $0x48] sm:$0xff] }
   0xd   :  { %v295_v61 = vand.u32 4294901760, %v294_v51  ;;  %v183_v63 = vand.u32 4294901760, %v182_v52  ;;  %v190_v0 = vand.u32 4294901760, %v189_v53  ;;  %v1494_v2 = vpack.c.bf16 %v136_v56, %v133_v54 }
   0xe   :  { %v302_v1 = vand.u32 4294901760, %v301_v55  ;;  %v1496_v3 = vsub.f32 %v45_v41, %v133_v54  ;;  %v308_v5 = vsub.f32 %v1434_v29, %v1930_v57  ;;  %v315_v7 = vsub.f32 %v1436_v30, %v1928_v58 }
   0xf   :  { %1177 = vmatpush3.bf16.msra.mxu0 %v1466_v49  ;;  %v1200_v6 = vpack.c.bf16 %v190_v0, %v183_v63  ;;  %v85_v8 = vand.u32 4294901760, %v29_v59  ;;  %v88_v9 = vand.u32 4294901760, %v30_v60  ;;  %v1927_v14 = vand.u32 4294901760, %v1440_v32 }
  0x10   :  { %v1198_v12 = vpack.c.bf16 %v302_v1, %v295_v61  ;;  %1179 = vmatprep.subr.bf16.mxu0 %v1494_v2  ;;  %v309_v13 = vand.u32 4294901760, %v308_v5  ;;  %v1925_v15 = vand.u32 4294901760, %v1453_v42  ;;  %v1517_v20 = vsub.f32 %v46_v46, %v136_v56  ;;  %v50_v1 = vld [vmem:[%s1915_s0 + $0xd8] sm:$0xff] }
  0x11   :  { %v316_v21 = vand.u32 4294901760, %v315_v7  ;;  %v1519_v22 = vpack.c.bf16 %v88_v9, %v85_v8  ;;  %v1521_v26 = vsub.f32 %v29_v59, %v85_v8  ;;  %v196_v27 = vsub.f32 %v1440_v32, %v1927_v14 }
  0x12   :  { %1199 = vmatprep.subr.bf16.mxu1 %v1198_v12  ;;  %v203_v33 = vsub.f32 %v1453_v42, %v1925_v15  ;;  %v139_v34 = vand.u32 4294901760, %v47_v10  ;;  %v142_v37 = vand.u32 4294901760, %v48_v11  ;;  %v1924_v46 = vand.u32 4294901760, %v1457_v44 }
  0x13   :  { %1201 = vmatpush3.bf16.msra.mxu1 %v1200_v6  ;;  %v1202_v41 = vpack.c.bf16 %v316_v21, %v309_v13  ;;  %1181 = vmatpush3.bf16.msra.mxu0 %v1519_v22  ;;  %v1923_v51 = vand.u32 4294901760, %v1463_v47  ;;  %v91_v52 = vand.u32 4294901760, %v31_v19  ;;  %v1535_v53 = vsub.f32 %v30_v60, %v88_v9  ;;  %v49_v60 = vld [vmem:[%s1915_s0 + $0xd0] sm:$0xff] }
  0x14   :  { %v197_v54 = vand.u32 4294901760, %v196_v27  ;;  %v204_v55 = vand.u32 4294901760, %v203_v33  ;;  %v1537_v56 = vpack.c.bf16 %v142_v37, %v139_v34  ;;  %v1539_v59 = vsub.f32 %v47_v10, %v139_v34  ;;  %v33_v9 = vld [vmem:[%s1915_s0 + $0x50] sm:$0xff] }
  0x15   :  { %1203 = vmatprep.subr.bf16.mxu1 %v1202_v41  ;;  %v322_v61 = vsub.f32 %v1457_v44, %v1924_v46  ;;  %v329_v63 = vsub.f32 %v1463_v47, %v1923_v51  ;;  %v94_v0 = vand.u32 4294901760, %v32_v38  ;;  %v1554_v6 = vsub.f32 %v48_v11, %v142_v37  ;;  %v34_v37 = vld [vmem:[%s1915_s0 + $0x58] sm:$0xff] }
  0x16   :  { %v1204_v5 = vpack.c.bf16 %v204_v55, %v197_v54  ;;  %1183 = vmatprep.subr.bf16.mxu0 %v1537_v56  ;;  %v1920_v7 = vand.u32 4294901760, %v1468_v50  ;;  %v1919_v8 = vand.u32 4294901760, %v1492_v62  ;;  %v1563_v21 = vsub.f32 %v31_v19, %v91_v52 }
  0x17   :  { %v323_v10 = vand.u32 4294901760, %v322_v61  ;;  %v330_v12 = vand.u32 4294901760, %v329_v63  ;;  %v1561_v13 = vpack.c.bf16 %v94_v0, %v91_v52  ;;  %v145_v33 = vand.u32 4294901760, %v49_v60 }
  0x18   :  { %1205 = vmatpush3.bf16.msra.mxu1 %v1204_v5  ;;  %v210_v11 = vsub.f32 %v1468_v50, %v1920_v7  ;;  %v217_v27 = vsub.f32 %v1492_v62, %v1919_v8  ;;  %v148_v34 = vand.u32 4294901760, %v50_v1  ;;  %v1922_v19 = vand.u32 4294901760, %v1496_v3 }
  0x19   :  { %v1206_v41 = vpack.c.bf16 %v330_v12, %v323_v10  ;;  %1185 = vmatpush3.bf16.msra.mxu0 %v1561_v13  ;;  %v1921_v52 = vand.u32 4294901760, %v1517_v20  ;;  %v97_v54 = vand.u32 4294901760, %v33_v9  ;;  %v1577_v55 = vsub.f32 %v32_v38, %v94_v0  ;;  %v51_v38 = vld [vmem:[%s1915_s0 + $0xe0] sm:$0xff]  ;;  %v52_v0 = vld [vmem:[%s1915_s0 + $0xe8] sm:$0xff] }
  0x1a   :  { %v211_v61 = vand.u32 4294901760, %v210_v11  ;;  %v218_v63 = vand.u32 4294901760, %v217_v27  ;;  %v1579_v5 = vpack.c.bf16 %v148_v34, %v145_v33  ;;  %v1581_v8 = vsub.f32 %v49_v60, %v145_v33 }
  0x1b   :  { %1207 = vmatprep.subr.bf16.mxu1 %v1206_v41  ;;  %v336_v10 = vsub.f32 %v1496_v3, %v1922_v19  ;;  %v343_v12 = vsub.f32 %v1517_v20, %v1921_v52  ;;  %v100_v7 = vand.u32 4294901760, %v34_v37  ;;  %v1596_v60 = vsub.f32 %v50_v1, %v148_v34  ;;  %v35_v41 = vld [vmem:[%s1915_s0 + $0x60] sm:$0xff] }
  0x1c   :  { %v1208_v11 = vpack.c.bf16 %v218_v63, %v211_v61  ;;  %1187 = vmatprep.subr.bf16.mxu0 %v1579_v5  ;;  %v1926_v27 = vand.u32 4294901760, %v1521_v26  ;;  %v1929_v33 = vand.u32 4294901760, %v1535_v53  ;;  %v1605_v46 = vsub.f32 %v33_v9, %v97_v54 }
  0x1d   :  { %v337_v52 = vand.u32 4294901760, %v336_v10  ;;  %v344_v19 = vand.u32 4294901760, %v343_v12  ;;  %v1603_v51 = vpack.c.bf16 %v100_v7, %v97_v54  ;;  %v151_v61 = vand.u32 4294901760, %v51_v38  ;;  %v36_v10 = vld [vmem:[%s1915_s0 + $0x68] sm:$0xff] }
  0x1e   :  { %1209 = vmatpush3.bf16.msra.mxu1 %v1208_v11  ;;  %v224_v1 = vsub.f32 %v1521_v26, %v1926_v27  ;;  %v231_v34 = vsub.f32 %v1535_v53, %v1929_v33  ;;  %v154_v63 = vand.u32 4294901760, %v52_v0  ;;  %v1932_v9 = vand.u32 4294901760, %v1539_v59 }
  0x1f   :  { %1965 = vst [vmem:[#allocation3_spill] sm:$0xff] %v1603_v51  ;;  %v1210_v12 = vpack.c.bf16 %v344_v19, %v337_v52  ;;  %1189 = vmatpush3.bf16.msra.mxu0 %v1603_v51  ;;  %v1931_v54 = vand.u32 4294901760, %v1554_v6  ;;  %v103_v11 = vand.u32 4294901760, %v35_v41  ;;  %v1619_v15 = vsub.f32 %v34_v37, %v100_v7  ;;  %v53_v7 = vld [vmem:[%s1915_s0 + $0xf0] sm:$0xff]  ;;  %v54_v37 = vld [vmem:[%s1915_s0 + $0xf8] sm:$0xff] }
  0x20   :  { %v225_v27 = vand.u32 4294901760, %v224_v1  ;;  %v232_v14 = vand.u32 4294901760, %v231_v34  ;;  %v1621_v58 = vpack.c.bf16 %v154_v63, %v151_v61  ;;  %v1623_v33 = vsub.f32 %v51_v38, %v151_v61 }
  0x21   :  { %1211 = vmatprep.subr.bf16.mxu1 %v1210_v12  ;;  %v350_v19 = vsub.f32 %v1539_v59, %v1932_v9  ;;  %v357_v52 = vsub.f32 %v1554_v6, %v1931_v54  ;;  %v106_v57 = vand.u32 4294901760, %v36_v10  ;;  %v1638_v38 = vsub.f32 %v52_v0, %v154_v63  ;;  %v37_v12 = vld [vmem:[%s1915_s0 + $0x70] sm:$0xff] }
  0x22   :  { %1966 = vst [vmem:[#allocation4_spill] sm:$0xff] %v1621_v58  ;;  %v1212_v1 = vpack.c.bf16 %v232_v14, %v225_v27  ;;  %1191 = vmatprep.subr.bf16.mxu0 %v1621_v58  ;;  %v1936_v34 = vand.u32 4294901760, %v1563_v21  ;;  %v1938_v61 = vand.u32 4294901760, %v1577_v55  ;;  %v1647_v39 = vsub.f32 %v35_v41, %v103_v11 }
  0x23   :  { %v351_v54 = vand.u32 4294901760, %v350_v19  ;;  %v358_v9 = vand.u32 4294901760, %v357_v52  ;;  %v1645_v40 = vpack.c.bf16 %v106_v57, %v103_v11  ;;  %v157_v27 = vand.u32 4294901760, %v53_v7  ;;  %v38_v19 = vld [vmem:[%s1915_s0 + $0x78] sm:$0xff] }
  0x24   :  { %1213 = vmatpush3.bf16.msra.mxu1 %v1212_v1  ;;  %v238_v14 = vsub.f32 %v1563_v21, %v1936_v34  ;;  %v245_v0 = vsub.f32 %v1577_v55, %v1938_v61  ;;  %v160_v63 = vand.u32 4294901760, %v54_v37  ;;  %v1940_v41 = vand.u32 4294901760, %v1581_v8 }
  0x25   :  { %1967 = vst [vmem:[#allocation5_spill] sm:$0xff] %v1645_v40  ;;  %v1214_v52 = vpack.c.bf16 %v358_v9, %v351_v54  ;;  %1193 = vmatpush3.bf16.msra.mxu0 %v1645_v40  ;;  %v1939_v11 = vand.u32 4294901760, %v1596_v60  ;;  %v109_v1 = vand.u32 4294901760, %v37_v12  ;;  %v1661_v48 = vsub.f32 %v36_v10, %v106_v57  ;;  %v20_v57 = vld [vmem:[%s1916_s1] sm:$0xf] }
  0x26   :  { %v239_v34 = vand.u32 4294901760, %v238_v14  ;;  %v246_v45 = vand.u32 4294901760, %v245_v0  ;;  %v1663_v28 = vpack.c.bf16 %v160_v63, %v157_v27  ;;  %v1665_v61 = vsub.f32 %v53_v7, %v157_v27  ;;  %v21_v10 = vld [vmem:[%s1917_s2] sm:$0xf] }
  0x27   :  { %1968 = vst [vmem:[#allocation6_spill] sm:$0xff] %v1661_v48  ;;  %1215 = vmatprep.subr.bf16.mxu1 %v1214_v52  ;;  %v364_v9 = vsub.f32 %v1581_v8, %v1940_v41  ;;  %v371_v54 = vsub.f32 %v1596_v60, %v1939_v11  ;;  %v112_v16 = vand.u32 4294901760, %v38_v19  ;;  %v1680_v7 = vsub.f32 %v54_v37, %v160_v63 }
  0x28   :  { %1969 = vst [vmem:[#allocation7_spill] sm:$0xff] %v1663_v28  ;;  %v1216_v14 = vpack.c.bf16 %v246_v45, %v239_v34  ;;  %1195 = vmatprep.subr.bf16.mxu0 %v1663_v28  ;;  %v1947_v0 = vand.u32 4294901760, %v1605_v46  ;;  %v1950_v27 = vand.u32 4294901760, %v1619_v15  ;;  %v1686_v40 = vsub.f32 %v37_v12, %v109_v1 }
  0x29   :  { %1970 = vst [vmem:[#allocation8_spill] sm:$0xff] %v1680_v7  ;;  %v365_v52 = vand.u32 4294901760, %v364_v9  ;;  %v372_v11 = vand.u32 4294901760, %v371_v54  ;;  %v1684_v41 = vpack.c.bf16 %v112_v16, %v109_v1  ;;  %v22_v37 = vmul.f32 %v21_v10, %v20_v57 }
  0x2a   :  { %1972 = vst [vmem:[#allocation10_spill] sm:$0xff] %v1686_v40  ;;  %1217 = vmatpush3.bf16.msra.mxu1 %v1216_v14  ;;  %v252_v58 = vsub.f32 %v1605_v46, %v1947_v0  ;;  %v259_v45 = vsub.f32 %v1619_v15, %v1950_v27  ;;  %v1973_v34 = vlaneseq  ;;  %v1953_v9 = vand.u32 4294901760, %v1623_v33 }
  0x2b   :  { %1971 = vst [vmem:[#allocation9_spill] sm:$0xff] %v1684_v41  ;;  %v1218_v28 = vpack.c.bf16 %v372_v11, %v365_v52  ;;  %1197 = vmatpush3.bf16.msra.mxu0 %v1684_v41  ;;  %v1951_v12 = vand.u32 4294901760, %v1638_v38  ;;  %v1230_v1 = vpack.c.bf16 %v1445_v36, %v1443_v35  ;;  %v1974_v0 = vunpack.c.0.s8 %v1393_v4 }
  0x2c   :  { %v60_v63 = vshrl.u32 %v1973_v34, 7  ;;  %v253_v54 = vand.u32 4294901760, %v252_v58  ;;  %v260_v14 = vand.u32 4294901760, %v259_v45  ;;  %v1952_v27 = vand.u32 4294901760, %v1647_v39 }
  0x2d   :  { %1219 = vmatprep.subr.bf16.mxu1 %v1218_v28  ;;  %v1703_v57 = vsub.f32 %v38_v19, %v112_v16  ;;  %v378_v11 = vsub.f32 %v1623_v33, %v1953_v9  ;;  %v385_v10 = vsub.f32 %v1638_v38, %v1951_v12  ;;  %1231 = vmatprep.subr.bf16.mxu0 %v1230_v1  ;;  %v272_v58 = vand.u32 4294901760, %v1661_v48 }
  0x2e   :  { %v61_v51 = vsub.s32 %v1974_v0, %v60_v63  ;;  %v1220_v52 = vpack.c.bf16 %v260_v14, %v253_v54  ;;  %v266_v4 = vsub.f32 %v1647_v39, %v1952_v27  ;;  %v391_v16 = vand.u32 4294901760, %v1665_v61 }
  0x2f   :  { %1975 = vst [vmem:[#allocation11_spill] sm:$0xff] %v1703_v57  ;;  %v379_v28 = vand.u32 4294901760, %v378_v11  ;;  %v386_v19 = vand.u32 4294901760, %v385_v10  ;;  %v273_v0 = vsub.f32 %v1661_v48, %v272_v58  ;;  %v398_v34 = vand.u32 4294901760, %v1680_v7 }
  0x30   :  { %v62_v45 = vrot.slane %v22_v37, %v61_v51  ;;  %1221 = vmatpush3.bf16.msra.mxu1 %v1220_v52  ;;  %v267_v1 = vand.u32 4294901760, %v266_v4  ;;  %v392_v54 = vsub.f32 %v1665_v61, %v391_v16  ;;  %v279_v9 = vand.u32 4294901760, %v1686_v40 }
  0x31   :  { %v1222_v51 = vpack.c.bf16 %v386_v19, %v379_v28  ;;  %v274_v37 = vand.u32 4294901760, %v273_v0  ;;  %v399_v14 = vsub.f32 %v1680_v7, %v398_v34  ;;  %v286_v48 = vand.u32 4294901760, %v1703_v57 }
  0x32   :  { %v63_v63 = vcombine.high %v62_v45, %v62_v45  ;;  %v1718_v12 = vand.u32 4294901760, %v62_v45  ;;  %v393_v10 = vand.u32 4294901760, %v392_v54  ;;  %v280_v19 = vsub.f32 %v1686_v40, %v279_v9 }
  0x33   :  { %1223 = vmatprep.subr.bf16.mxu1 %v1222_v51  ;;  %v1224_v52 = vpack.c.bf16 %v274_v37, %v267_v1  ;;  %v400_v41 = vand.u32 4294901760, %v399_v14  ;;  %v1232_v7 = vpack.c.bf16 %v1422_v24, %v1412_v18 }
  0x34   :  { %v1722_v27 = vand.u32 4294901760, %v63_v63  ;;  %v1725_v11 = vsub.f32 %v62_v45, %v1718_v12  ;;  %v287_v45 = vsub.f32 %v1703_v57, %v286_v48  ;;  %v281_v51 = vand.u32 4294901760, %v280_v19 }
  0x35   :  { %1225 = vmatpush3.bf16.msra.mxu1 %v1224_v52  ;;  %v1226_v0 = vpack.c.bf16 %v400_v41, %v393_v10  ;;  %v1978_v10 = vand.u32 4294901760, %v1443_v35  ;;  %v1979_v57 = vand.u32 4294901760, %v1445_v36  ;;  %v1980_v19 = vand.u32 4294901760, %v1412_v18 }
  0x36   :  { %1976 = vst [vmem:[#allocation12_spill] sm:$0xff] %v1722_v27  ;;  %1977 = vst [vmem:[#allocation13_spill] sm:$0xff] %v1725_v11  ;;  %v163_v4 = vsub.f32 %v63_v63, %v1722_v27  ;;  %v1962_v28 = vand.u32 4294901760, %v1725_v11  ;;  %403 = vmatprep.mubr.f32.mxu1 %v1722_v27  ;;  %v288_v37 = vand.u32 4294901760, %v287_v45  ;;  %v1234_v27 = vpack.c.bf16 %v1436_v30, %v1434_v29 }
  0x37   :  { %1227 = vmatprep.subr.bf16.mxu1 %v1226_v0  ;;  %v1745_v40 = vpack.c.bf16 %v1979_v57, %v1978_v10  ;;  %v1981_v0 = vand.u32 4294901760, %v1422_v24  ;;  %v1985_v35 = vand.u32 4294901760, %v1453_v42  ;;  %v1986_v57 = vand.u32 4294901760, %v1457_v44 }
  0x38   :  { %v164_v54 = vand.u32 4294901760, %v163_v4  ;;  %v171_v1 = vsub.f32 %v1725_v11, %v1962_v28  ;;  %v1228_v52 = vpack.c.bf16 %v288_v37, %v281_v51  ;;  %v1983_v28 = vand.u32 4294901760, %v1436_v30 }
  0x39   :  { %v1751_v45 = vpack.c.bf16 %v1981_v0, %v1980_v19  ;;  %v1984_v51 = vand.u32 4294901760, %v1440_v32  ;;  %v1987_v18 = vand.u32 4294901760, %v1463_v47  ;;  %v1988_v37 = vand.u32 4294901760, %v1468_v50 }
  0x3a   :  { %v165_v14 = vsub.f32 %v163_v4, %v164_v54  ;;  %v172_v63 = vand.u32 4294901760, %v171_v1  ;;  %v1982_v1 = vand.u32 4294901760, %v1434_v29  ;;  %1229 = vmatpush3.bf16.msra.mxu1 %v1228_v52  ;;  %v1989_v29 = vand.u32 4294901760, %v1492_v62 }
  0x3b   :  { %v1763_v36 = vpack.c.bf16 %v1985_v35, %v1984_v51  ;;  %v1769_v24 = vpack.c.bf16 %v1987_v18, %v1986_v57  ;;  %1263 = vmatprep.subr.bf16.mxu1 %v1410_v17  ;;  %v1992_v10 = vand.u32 4294901760, %v1521_v26  ;;  %v1993_v19 = vand.u32 4294901760, %v1535_v53 }
  0x3c   :  { %v166_v41 = vand.u32 4294901760, %v165_v14  ;;  %v1757_v11 = vpack.c.bf16 %v1983_v28, %v1982_v1  ;;  %v1775_v30 = vpack.c.bf16 %v1989_v29, %v1988_v37  ;;  %v1990_v28 = vand.u32 4294901760, %v1496_v3 }
  0x3d   :  { %v1991_v14 = vand.u32 4294901760, %v1517_v20  ;;  %v1788_v0 = vpack.c.bf16 %v1993_v19, %v1992_v10  ;;  %v1994_v1 = vand.u32 4294901760, %v1539_v59  ;;  %v1995_v51 = vand.u32 4294901760, %v1554_v6  ;;  %405 = vmatmul.mubr.f32.vlgmr.msra.gmra.mrb[0].mxu1 %v1718_v12 }
  0x3e   :  { %167 = vmatprep.mubr.f32.mxu0 %v166_v41  ;;  %v1997_v57 = vand.u32 4294901760, %v1563_v21  ;;  %v1998_v18 = vand.u32 4294901760, %v1577_v55  ;;  %v1999_v41 = vand.u32 4294901760, %v1581_v8  ;;  %v2000_v29 = vand.u32 4294901760, %v1596_v60  ;;  %1265 = vmatpush3.bf16.msra.mxu1 %v1420_v23 }
  0x3f   :  { %v1781_v52 = vpack.c.bf16 %v1991_v14, %v1990_v28  ;;  %v1794_v35 = vpack.c.bf16 %v1995_v51, %v1994_v1  ;;  %173 = vmatmul.mubr.f32.vlgmr.msra.gmra.mrb[0].mxu0 %v172_v63  ;;  %v2001_v14 = vand.u32 4294901760, %v1605_v46  ;;  %v2002_v10 = vand.u32 4294901760, %v1619_v15  ;;  %1267 = vmatprep.subr.bf16.mxu1 %v1424_v25 }
  0x40   :  { %v1800_v37 = vpack.c.bf16 %v1998_v18, %v1997_v57  ;;  %v1806_v28 = vpack.c.bf16 %v2000_v29, %v1999_v41  ;;  %v2003_v1 = vand.u32 4294901760, %v1623_v33  ;;  %v2004_v51 = vand.u32 4294901760, %v1638_v38  ;;  %1233 = vmatpush3.bf16.msra.mxu0 %v1232_v7  ;;  %540 = vmatprep.mubr.f32.mxu0 %v163_v4 }
  0x41   :  { %1996 = vst [vmem:[#allocation14_spill] sm:$0xff] %v1794_v35  ;;  %v1812_v19 = vpack.c.bf16 %v2002_v10, %v2001_v14  ;;  %v2005_v63 = vand.u32 4294901760, %v1647_v39  ;;  %v1236_v18 = vpack.c.bf16 %v1453_v42, %v1440_v32  ;;  %v1827_v41 = vpack.c.bf16 %v398_v34, %v391_v16  ;;  %1235 = vmatprep.subr.bf16.mxu0 %v1234_v27 }
  0x42   :  { %v1818_v35 = vpack.c.bf16 %v2004_v51, %v2003_v1  ;;  %v1829_v29 = vpack.c.bf16 %v286_v48, %v279_v9  ;;  %v1238_v14 = vpack.c.bf16 %v1463_v47, %v1457_v44  ;;  %647 = vmatprep.mubr.f32.mxu1 %v164_v54  ;;  %v1240_v32 = vpack.c.bf16 %v1492_v62, %v1468_v50 }
  0x43   :  { %v1822_v57 = vpack.c.bf16 %v272_v58, %v2005_v63  ;;  %v1242_v42 = vpack.c.bf16 %v1517_v20, %v1496_v3  ;;  %1269 = vmatpush3.bf16.msra.mxu1 %v1438_v31  ;;  %v1244_v44 = vpack.c.bf16 %v1535_v53, %v1521_v26  ;;  %v1246_v47 = vpack.c.bf16 %v1554_v6, %v1539_v59  ;;  %v2006_v20 = vld [vmem:[#allocation6_spill] sm:$0xff]  ;;  %v2007_v53 = vld [vmem:[#allocation8_spill] sm:$0xff]  ;;  %v2008_v6 = vld [vmem:[#allocation3_spill] sm:$0xff] }
  0x44   :  { %1237 = vmatpush3.bf16.msra.mxu0 %v1236_v18  ;;  %1271 = vmatprep.subr.bf16.mxu1 %v1455_v43  ;;  %v1248_v48 = vpack.c.bf16 %v1577_v55, %v1563_v21  ;;  %v1250_v50 = vpack.c.bf16 %v1596_v60, %v1581_v8  ;;  %v1252_v62 = vpack.c.bf16 %v1619_v15, %v1605_v46  ;;  %v2009_v8 = vld [vmem:[#allocation4_spill] sm:$0xff]  ;;  %v2010_v15 = vld [vmem:[#allocation10_spill] sm:$0xff]  ;;  %v2011_v46 = vld [vmem:[#allocation11_spill] sm:$0xff] }
  0x45   :  { %1239 = vmatprep.subr.bf16.mxu0 %v1238_v14  ;;  %v1254_v3 = vpack.c.bf16 %v1638_v38, %v1623_v33  ;;  %v1256_v26 = vpack.c.bf16 %v2006_v20, %v1647_v39  ;;  %v1258_v59 = vpack.c.bf16 %v2007_v53, %v1665_v61  ;;  %v1260_v21 = vpack.c.bf16 %v2011_v46, %v2010_v15  ;;  %v2012_v55 = vld [vmem:[#allocation5_spill] sm:$0xff]  ;;  %v2013_v60 = vld [vmem:[#allocation7_spill] sm:$0xff]  ;;  %v2017_v61 = vld [vmem:[#allocation12_spill] sm:$0xff] }
  0x46   :  { %v2014_v39 = vld [vmem:[#allocation9_spill] sm:$0xff] }
  0x47   :  { %1273 = vmatpush3.bf16.msra.mxu1 %v1466_v49  ;;  %v2015_v33 = vld [vmem:[#allocation13_spill] sm:$0xff] }
  0x48   :  { %1241 = vmatpush3.bf16.msra.mxu0 %v1240_v32  ;;  %1275 = vmatprep.subr.bf16.mxu1 %v1494_v2  ;;  %v2016_v38 = vand.u32 4294901760, %v2015_v33 }
  0x49   :  { %1243 = vmatprep.subr.bf16.mxu0 %v1242_v42 }
  0x4b   :  { %1277 = vmatpush3.bf16.msra.mxu1 %v1519_v22 }
  0x4c   :  { %1245 = vmatpush3.bf16.msra.mxu0 %v1244_v44  ;;  %1279 = vmatprep.subr.bf16.mxu1 %v1537_v56 }
  0x4d   :  { %1247 = vmatprep.subr.bf16.mxu0 %v1246_v47 }
  0x4f   :  { %1281 = vmatpush3.bf16.msra.mxu1 %v1561_v13 }
  0x50   :  { %1249 = vmatpush3.bf16.msra.mxu0 %v1248_v48  ;;  %1283 = vmatprep.subr.bf16.mxu1 %v1579_v5 }
  0x51   :  { %1251 = vmatprep.subr.bf16.mxu0 %v1250_v50 }
  0x53   :  { %1285 = vmatpush3.bf16.msra.mxu1 %v2008_v6 }
  0x54   :  { %1253 = vmatpush3.bf16.msra.mxu0 %v1252_v62  ;;  %1287 = vmatprep.subr.bf16.mxu1 %v2009_v8 }
  0x55   :  { %1255 = vmatprep.subr.bf16.mxu0 %v1254_v3 }
  0x57   :  { %1289 = vmatpush3.bf16.msra.mxu1 %v2012_v55 }
  0x58   :  { %1257 = vmatpush3.bf16.msra.mxu0 %v1256_v26  ;;  %1291 = vmatprep.subr.bf16.mxu1 %v2013_v60 }
  0x59   :  { %1259 = vmatprep.subr.bf16.mxu0 %v1258_v59 }
  0x5b   :  { %1293 = vmatpush3.bf16.msra.mxu1 %v2014_v39 }
  0x5c   :  { %1261 = vmatpush3.bf16.msra.mxu0 %v1260_v21  ;;  %1327 = vmatprep.subr.bf16.mxu1 %v1410_v17  ;;  %v2018_v17 = vld [vmem:[#allocation14_spill] sm:$0xff] }
  0x5d   :  { %1295 = vmatprep.subr.bf16.mxu0 %v1745_v40 }
  0x5e   :  { %651 = vmatmul.mubr.f32.vlgmr.msra.gmra.mrb[2].mxu1 %v2016_v38 }
  0x5f   :  { %543 = vmatmul.mubr.f32.vlgmr.msra.gmra.mrb[2].mxu0 %v2015_v33  ;;  %1329 = vmatpush3.bf16.msra.mxu1 %v1420_v23  ;;  %v1363_v23 = vmov 0.0  }
  0x60   :  { %1297 = vmatpush3.bf16.msra.mxu0 %v1751_v45  ;;  %1331 = vmatprep.subr.bf16.mxu1 %v1424_v25  ;;  %19 = vst.msk [vmem:[#allocation2] sm:$0x3] %vm18_vm0, %v1363_v23 }
  0x61   :  { %1299 = vmatprep.subr.bf16.mxu0 %v1757_v11  ;;  %817 = vmatprep.mubr.f32.mxu0 %v2017_v61 }
  0x62   :  { %921 = vmatprep.mubr.f32.mxu1 %v2017_v61 }
  0x63   :  { %1333 = vmatpush3.bf16.msra.mxu1 %v1438_v31 }
  0x64   :  { %1301 = vmatpush3.bf16.msra.mxu0 %v1763_v36  ;;  %1335 = vmatprep.subr.bf16.mxu1 %v1455_v43 }
  0x65   :  { %1303 = vmatprep.subr.bf16.mxu0 %v1769_v24 }
  0x67   :  { %1337 = vmatpush3.bf16.msra.mxu1 %v1466_v49  ;;  %v938_v51 = vld [vmem:[#allocation2] sm:$0x3] }
  0x68   :  { %1305 = vmatpush3.bf16.msra.mxu0 %v1775_v30  ;;  %1339 = vmatprep.subr.bf16.mxu1 %v1494_v2 }
  0x69   :  { %1307 = vmatprep.subr.bf16.mxu0 %v1781_v52 }
  0x6b   :  { %1341 = vmatpush3.bf16.msra.mxu1 %v1519_v22 }
  0x6c   :  { %1309 = vmatpush3.bf16.msra.mxu0 %v1788_v0  ;;  %1343 = vmatprep.subr.bf16.mxu1 %v1537_v56 }
  0x6d   :  { %1311 = vmatprep.subr.bf16.mxu0 %v2018_v17 }
  0x6f   :  { %1345 = vmatpush3.bf16.msra.mxu1 %v1561_v13 }
  0x70   :  { %1313 = vmatpush3.bf16.msra.mxu0 %v1800_v37  ;;  %1347 = vmatprep.subr.bf16.mxu1 %v1579_v5 }
  0x71   :  { %1315 = vmatprep.subr.bf16.mxu0 %v1806_v28 }
  0x73   :  { %1349 = vmatpush3.bf16.msra.mxu1 %v2008_v6 }
  0x74   :  { %1317 = vmatpush3.bf16.msra.mxu0 %v1812_v19  ;;  %1351 = vmatprep.subr.bf16.mxu1 %v2009_v8 }
  0x75   :  { %1319 = vmatprep.subr.bf16.mxu0 %v1818_v35 }
  0x77   :  { %1353 = vmatpush3.bf16.msra.mxu1 %v2012_v55 }
  0x78   :  { %1321 = vmatpush3.bf16.msra.mxu0 %v1822_v57  ;;  %1355 = vmatprep.subr.bf16.mxu1 %v2013_v60 }
  0x79   :  { %1323 = vmatprep.subr.bf16.mxu0 %v1827_v41 }
  0x7b   :  { %1357 = vmatpush3.bf16.msra.mxu1 %v2014_v39 }
  0x7c   :  { %1325 = vmatpush3.bf16.msra.mxu0 %v1829_v29 }
  0x7e   :  { %923 = vmatmul.mubr.f32.vlgmr.msra.gmra.mrb[4].mxu1 %v1718_v12 }
  0x7f   :  { %819 = vmatmul.mubr.f32.vlgmr.msra.gmra.mrb[4].mxu0 %v1718_v12 }
 0x110   :  { %v1023_v40 = vpop.f32.mrb[0].mxu1 }
 0x111   :  { %v1024_v49 = vpop.f32.mrb[1].mxu1 }
 0x112   :  { %v988_v25 = vpop.f32.mrb[0].mxu0  ;;  %v1025_v2 = vadd.f32 %v1024_v49, %v1023_v40 }
 0x113   :  { %v989_v31 = vpop.f32.mrb[1].mxu0 }
 0x114   :  { %v990_v43 = vadd.f32 %v989_v31, %v988_v25 }
 0x116   :  { %v407_v22 = vadd.f32 %v1025_v2, %v990_v43 }
 0x131   :  { %v1093_v5 = vpop.f32.mrb[2].mxu1 }
 0x132   :  { %v1058_v56 = vpop.f32.mrb[2].mxu0  ;;  %v1094_v27 = vpop.f32.mrb[3].mxu1 }
 0x133   :  { %v1059_v13 = vpop.f32.mrb[3].mxu0  ;;  %v1095_v9 = vadd.f32 %v1094_v27, %v1093_v5 }
 0x134   :  { %v1060_v7 = vadd.f32 %v1059_v13, %v1058_v56 }
 0x136   :  { %v545_v58 = vadd.f32 %v1060_v7, %v407_v22 }
 0x138   :  { %v653_v16 = vadd.f32 %v1095_v9, %v545_v58 }
 0x151   :  { %v1163_v11 = vpop.f32.mrb[4].mxu1 }
 0x152   :  { %v1128_v12 = vpop.f32.mrb[4].mxu0  ;;  %v1164_v54 = vpop.f32.mrb[5].mxu1 }
 0x153   :  { %v1129_v34 = vpop.f32.mrb[5].mxu0  ;;  %v1165_v45 = vadd.f32 %v1164_v54, %v1163_v11 }
 0x154   :  { %v1130_v4 = vadd.f32 %v1129_v34, %v1128_v12 }
 0x156   :  { %v821_v36 = vadd.f32 %v1130_v4, %v653_v16 }
 0x158   :  { %v925_v24 = vadd.f32 %v1165_v45, %v821_v36 }
 0x15a   :  { %v928_v30 = vmul.f32 2.0, %v925_v24 }
 0x15c   :  { %v929_v52 = vsub.f32 2.0, %v928_v30 }
 0x15e   :  { %v930_v0 = vmax.f32 %v929_v52, 0.0 }
 0x160   :  { %1360 = vrsqrt.f32 %v930_v0  ;;  %vm933_vm1 = vcmp.eq.f32.partialorder %v930_v0, inf  ;;  %v936_v28 = vand.u32 2147483648, %v930_v0  ;;  %vm935_vm3 = vcmp.eq.f32.partialorder %v930_v0, 0.0 }
 0x16a   :  { %v1361_v35 = vpop.eup %1360 }
 0x16b   :  { %v932_v37 = vmul.f32 %v1361_v35, %v930_v0 }
 0x16d   :  { %v934_v10 = vsel %vm933_vm1, %v930_v0, %v932_v37 }
 0x16e   :  { %v937_v19 = vsel %vm935_vm3, %v936_v28, %v934_v10 }
 0x16f   :  { %v940_v1 = vsel %vm939_vm2, %v937_v19, 0.0 }
 0x170   :  { %941 = vadd.xlane.f32.xlu0 %v940_v1 }
 0x1fd   :  { %v942_v63 = vpop.xlane.xlu0 %941 }
 0x1fe   :  { %v943_v57 = vadd.f32 %v942_v63, %v938_v51 }
 0x200   :  { %945 = vst.msk [vmem:[#allocation2] sm:$0x3] %vm18_vm0, %v943_v57 }
 0x207   :  { %v949_v18 = vld [vmem:[#allocation2] sm:$0x3] }
 0x208   :  { %v950_v41 = vmul.f32 0.125, %v949_v18 }
 0x20a   :  { %951 = vst.msk [vmem:[%s1918_s3] sm:$0x3] %vm18_vm0, %v950_v41 }

</bundles_post_ra>
